<compile_context>
chip_gen: v6e
topology: v6e:2x2x1
jax: 0.10.0
libtpu: 0.0.40
codegen_flags: <defaults>
</compile_context>

<pallas_src>
import numpy as np

import jax
import jax.numpy as jnp
from jax.experimental import pallas as pl
from jax.experimental.pallas import tpu as pltpu


def _rope_kernel(inv_freq_ref, pos_ref, cos_ref, sin_ref):
    # inv_freq_ref: (1, half) f32      pos_ref: (tile_n, 1) f32
    # cos_ref / sin_ref: (tile_n, dim) out dtype, dim == 2 * half
    half = inv_freq_ref.shape[-1]
    pos = pos_ref[...]                       # (tile_n, 1)
    inv_freq = inv_freq_ref[...]             # (1, half)
    freqs = pos * inv_freq                   # broadcast outer product -> (tile_n, half)

    # Evaluate the transcendentals once on the half-width freqs.
    c = jnp.cos(freqs).astype(cos_ref.dtype)
    s = jnp.sin(freqs).astype(sin_ref.dtype)

    # emb = cat(freqs, freqs): write each half once.  Two aligned, unmasked,
    # lane-dense 128-wide stores; deliberately NOT a concatenate (XLU shuffle
    # + vreg pressure, and v5e has a single vst slot).
    cos_ref[:, :half] = c
    cos_ref[:, half:] = c
    sin_ref[:, :half] = s
    sin_ref[:, half:] = s


def _rope_table(pos_flat, dim, base, out_dtype, tile_n):
    """Runs the kernel over a flat token axis. Returns (cos, sin) of (N, dim)."""
    N = pos_flat.shape[0]
    half = dim // 2

    # Deterministic buffer from GemmaRotaryEmbedding.__init__.
    inv_freq = 1.0 / (base ** (jnp.arange(0, dim, 2, dtype=jnp.float32) / dim))
    inv_freq = inv_freq.reshape(1, half)
    pos = pos_flat.astype(jnp.float32).reshape(N, 1)

    # A full-extent block (tile_n == N) is always legal; otherwise keep tile_n
    # a multiple of 8 (sublane alignment) and let Pallas clip the last block.
    if N <= tile_n:
        tile_n = N
    else:
        tile_n = max(8, tile_n - tile_n % 8)
    grid = (pl.cdiv(N, tile_n),)

    cos, sin = pl.pallas_call(
        _rope_kernel,
        grid=grid,
        out_shape=(
            jax.ShapeDtypeStruct((N, dim), out_dtype),
            jax.ShapeDtypeStruct((N, dim), out_dtype),
        ),
        in_specs=[
            pl.BlockSpec((1, half), lambda i: (0, 0)),       # tiny, reused per tile
            pl.BlockSpec((tile_n, 1), lambda i: (i, 0)),     # per-tile positions
        ],
        out_specs=(
            pl.BlockSpec((tile_n, dim), lambda i: (i, 0)),
            pl.BlockSpec((tile_n, dim), lambda i: (i, 0)),
        ),
        compiler_params=pltpu.CompilerParams(
            dimension_semantics=("parallel",),               # megacore-shardable on v7x
            vmem_limit_bytes=32 * 1024 * 1024,               # headroom for 2048-row tiles
        ),
    )(inv_freq, pos)
    return cos, sin


def gemma_rotary_embedding(x, position_ids, dim, base=10000.0, tile_n=2048):
    """Returns (cos, sin), each of shape (B, S, dim) with dtype x.dtype.

    Matches GemmaRotaryEmbedding.forward: freqs = pos * inv_freq,
    emb = cat(freqs, freqs), cos/sin computed in f32 and cast to x.dtype.
    """
    B, S = position_ids.shape
    assert dim % 2 == 0
    out_dtype = x.dtype

    # Batch dedup: if all rows of position_ids are identical (the common
    # prefill/decode case) compute the (S, dim) table once and broadcast.
    # Only possible when position_ids is concrete (not a tracer).
    dedup = False
    try:
        p_np = np.asarray(position_ids)
        dedup = bool(np.all(p_np == p_np[0:1]))
    except Exception:
        dedup = False

    if dedup:
        cos, sin = _rope_table(position_ids[0], dim, base, out_dtype, tile_n)
        cos = jnp.broadcast_to(cos[None], (B, S, dim))
        sin = jnp.broadcast_to(sin[None], (B, S, dim))
        return cos, sin

    cos, sin = _rope_table(position_ids.reshape(B * S), dim, base, out_dtype, tile_n)
    return cos.reshape(B, S, dim), sin.reshape(B, S, dim)


def _reference(x, position_ids, dim, base=10000.0):
    # Pure-JAX reference mirroring the PyTorch code exactly.
    inv_freq = 1.0 / (base ** (jnp.arange(0, dim, 2, dtype=jnp.float32) / dim))
    inv_freq_expanded = inv_freq[None, :, None].astype(jnp.float32)        # (1, half, 1)
    inv_freq_expanded = jnp.broadcast_to(
        inv_freq_expanded, (position_ids.shape[0], dim // 2, 1))
    position_ids_expanded = position_ids[:, None, :].astype(jnp.float32)   # (B, 1, S)
    freqs = jnp.matmul(inv_freq_expanded, position_ids_expanded)           # (B, half, S)
    freqs = jnp.transpose(freqs, (0, 2, 1))                                # (B, S, half)
    emb = jnp.concatenate([freqs, freqs], axis=-1)                         # (B, S, dim)
    return jnp.cos(emb).astype(x.dtype), jnp.sin(emb).astype(x.dtype)


def _check(B, S, dim, tile_n, key, dtype=jnp.float32, position_ids=None, tol=1e-3):
    x = jax.random.normal(key, (B, S, dim)).astype(dtype)  # only dtype is used
    if position_ids is None:
        position_ids = jnp.tile(jnp.arange(S, dtype=jnp.int32)[None, :], (B, 1))

    cos, sin = gemma_rotary_embedding(x, position_ids, dim, tile_n=tile_n)
    cos = jax.block_until_ready(cos)
    sin = jax.block_until_ready(sin)

    cos_ref, sin_ref = _reference(x, position_ids, dim)
    assert cos.shape == (B, S, dim) and sin.shape == (B, S, dim)
    assert cos.dtype == x.dtype and sin.dtype == x.dtype
    assert jnp.allclose(cos.astype(jnp.float32), cos_ref.astype(jnp.float32),
                        atol=tol, rtol=tol)
    assert jnp.allclose(sin.astype(jnp.float32), sin_ref.astype(jnp.float32),
                        atol=tol, rtol=tol)


if __name__ == "__main__":
    key = jax.random.PRNGKey(0)
    k0, k1, k2, k3 = jax.random.split(key, 4)

    # Small case at the module's real head_dim = 256 (dedup path, single tile).
    _check(B=2, S=16, dim=256, tile_n=2048, key=k0)

    # bf16 production dtype (half the HBM writeback; stores stay lane-dense).
    _check(B=2, S=16, dim=256, tile_n=2048, key=k1, dtype=jnp.bfloat16, tol=2e-2)

    # Multi-tile case with a partial last block at the production tile size
    # (dedup path: kernel runs over S tokens, wrapper broadcasts to B).
    _check(B=2, S=2176, dim=256, tile_n=2048, key=k2)

    # Non-identical position rows: exercises the non-dedup (B*S) path.
    pos_rows = jnp.stack([jnp.arange(16, dtype=jnp.int32),
                          100 + jnp.arange(16, dtype=jnp.int32)], axis=0)
    _check(B=2, S=16, dim=256, tile_n=2048, key=k3, position_ids=pos_rows)

    print("KERNEL_OK")
</pallas_src>

<mosaic_0001>
module attributes {stable_mosaic.version = 11 : i64} {
  func.func @_rope_kernel(%arg0: i32, %arg1: memref<1x128xf32, #tpu.memory_space<vmem>>, %arg2: memref<16x1xf32, #tpu.memory_space<vmem>>, %arg3: memref<16x256xf32, #tpu.memory_space<vmem>>, %arg4: memref<16x256xf32, #tpu.memory_space<vmem>>) attributes {dimension_semantics = [#tpu.dimension_semantics<parallel>], iteration_bounds = array<i64: 1>, scalar_prefetch = 0 : i64, scratch_operands = 0 : i64, tpu.core_type = #tpu.core_type<tc>, window_params = [{pipeline_mode = #tpu.pipeline_mode<synchronous>, transform_indices = @transform_0, window_bounds = array<i64: 1, 128>}, {transform_indices = @transform_1, window_bounds = array<i64: 16, 1>}, {transform_indices = @transform_2, window_bounds = array<i64: 16, 256>}, {transform_indices = @transform_3, window_bounds = array<i64: 16, 256>}]} {
    %c0 = arith.constant 0 : index
    %c0_0 = arith.constant 0 : index
    %0 = vector.load %arg2[%c0, %c0_0] : memref<16x1xf32, #tpu.memory_space<vmem>>, vector<16x1xf32>
    %c0_1 = arith.constant 0 : index
    %c0_2 = arith.constant 0 : index
    %1 = vector.load %arg1[%c0_1, %c0_2] : memref<1x128xf32, #tpu.memory_space<vmem>>, vector<1x128xf32>
    %2 = vector.broadcast %0 : vector<16x1xf32> to vector<16x128xf32>
    %3 = vector.broadcast %1 : vector<1x128xf32> to vector<16x128xf32>
    %4 = arith.mulf %2, %3 : vector<16x128xf32>
    %5 = math.cos %4 : vector<16x128xf32>
    %6 = math.sin %4 : vector<16x128xf32>
    %c0_3 = arith.constant 0 : index
    %c0_4 = arith.constant 0 : index
    %7 = vector.load %arg3[%c0_3, %c0_4] : memref<16x256xf32, #tpu.memory_space<vmem>>, vector<16x128xf32>
    tpu.vector_store %arg3[%c0_3, %c0_4], %5 {strides = array<i32>} : memref<16x256xf32, #tpu.memory_space<vmem>>, vector<16x128xf32>,
    %c0_5 = arith.constant 0 : index
    %c128 = arith.constant 128 : index
    %8 = vector.load %arg3[%c0_5, %c128] : memref<16x256xf32, #tpu.memory_space<vmem>>, vector<16x128xf32>
    tpu.vector_store %arg3[%c0_5, %c128], %5 {strides = array<i32>} : memref<16x256xf32, #tpu.memory_space<vmem>>, vector<16x128xf32>,
    %c0_6 = arith.constant 0 : index
    %c0_7 = arith.constant 0 : index
    %9 = vector.load %arg4[%c0_6, %c0_7] : memref<16x256xf32, #tpu.memory_space<vmem>>, vector<16x128xf32>
    tpu.vector_store %arg4[%c0_6, %c0_7], %6 {strides = array<i32>} : memref<16x256xf32, #tpu.memory_space<vmem>>, vector<16x128xf32>,
    %c0_8 = arith.constant 0 : index
    %c128_9 = arith.constant 128 : index
    %10 = vector.load %arg4[%c0_8, %c128_9] : memref<16x256xf32, #tpu.memory_space<vmem>>, vector<16x128xf32>
    tpu.vector_store %arg4[%c0_8, %c128_9], %6 {strides = array<i32>} : memref<16x256xf32, #tpu.memory_space<vmem>>, vector<16x128xf32>,
    return
  }
  func.func @transform_0(%arg0: i32) -> (i32, i32) {
    %c0_i32 = arith.constant 0 : i32
    %c0_i32_0 = arith.constant 0 : i32
    %c0_i32_1 = arith.constant 0 : i32
    return %c0_i32, %c0_i32_0 : i32, i32
  }
  func.func @transform_1(%arg0: i32) -> (i32, i32) {
    %c0_i32 = arith.constant 0 : i32
    %c0_i32_0 = arith.constant 0 : i32
    return %arg0, %c0_i32 : i32, i32
  }
  func.func @transform_2(%arg0: i32) -> (i32, i32) {
    %c0_i32 = arith.constant 0 : i32
    %c0_i32_0 = arith.constant 0 : i32
    return %arg0, %c0_i32 : i32, i32
  }
  func.func @transform_3(%arg0: i32) -> (i32, i32) {
    %c0_i32 = arith.constant 0 : i32
    %c0_i32_0 = arith.constant 0 : i32
    return %arg0, %c0_i32 : i32, i32
  }
}

</mosaic_0001>

<bundles_post_ra>
// kernel: tpu_custom_call.1
= control target key start
LH: loop header
LB: loop body
LE: loop exit
PB: predicated region body
PF: predicated region fallthrough
CT: control target
= control target key end

     0   :  { %9 = vsyncpa [#allocation3], 0  ;;  %v579_v1 = vmov 0   ;;  %s685_s0 = inlined_call_operand.vmem [shape: f32[1,128], index: 0, kind: input, shape index: {}]   ;;  %s686_s1 = inlined_call_operand.vmem [shape: f32[16,1], index: 1, kind: input, shape index: {}]   ;;  %s687_s2 = inlined_call_operand.hbm [shape: f32[16,256], index: 2, kind: output, shape index: {0}]   ;;  %s688_s3 = inlined_call_operand.hbm [shape: f32[16,256], index: 3, kind: output, shape index: {1}]  }
   0x1   :  { %v15_v0 = vld [vmem:[%s686_s1] sm:$0xff]  ;;  %526 = vset.pattern.permute.xlu0 %v579_v1  ;;  %v16_v2 = vld [vmem:[%s686_s1 + $0x8] sm:$0xff] }
   0x2   :  { %20 = vperm.xlu0 %526, %v15_v0  }
   0x3   :  { %10 = vsyncpa [#allocation5], 0  ;;  %v490_v3 = vld [vmem:[%s685_s0] ss:$0 sm:$0xff]  ;;  %v580_v24 = vmov 683565275  }
   0x4   :  { %v581_v28 = vmov 2475754826   ;;  %v582_v30 = vmov 2131351028   ;;  %v583_v32 = vmov 2102212464  }
   0x5   :  { %v584_v34 = vmov 920167782   ;;  %v585_v41 = vmov 1326507024   ;;  %s586_s0 = smov [#allocation2]   ;;  %s587_s18 = smov [#allocation4]  }
   0x6   :  { %25 = vperm.xlu0 %526, %v16_v2   ;;  %s463_s1 = sshll.u32 %s586_s0, 4  ;;  %s475_s19 = sshll.u32 %s587_s18, 4  ;;  %s464_s1 = int_to_ptr.vmem [resolvable:$true] %s463_s1  ;;  %s476_s19 = int_to_ptr.vmem [resolvable:$true] %s475_s19 }
   0x7   :  { %s535_s20 = scalar_lea.vmem %s464_s1, 512  ;;  %p540_p1 = scmp.lt.s32.totalorder %s464_s1, %s464_s1 }
   0x8   :  { %p536_p0 = scmp.ne.s32.totalorder %s464_s1, %s535_s20  ;;  %p541_p2 = scmp.lt.s32.totalorder %s535_s20, %s535_s20 }
   0xa   :  { %p542_p3 = por %p541_p2, %p540_p1 }
   0xc   :  { %p543_p4 = pnand %p542_p3, %p536_p0 }
  0x7d   :  { %v21_v4 = vpop.permute.xlu0 %20 }
  0x7e   :  { %v619_v5 = vmul.f32 %v490_v3, %v21_v4 }
  0x80   :  { %v36_v6 = vand.u32 2147483647, %v619_v5  ;;  %v39_v7 = vand.u32 2139095040, %v619_v5  ;;  %vm38_vm14 = vcmp.lt.s32.totalorder %v619_v5, 0 }
  0x81   :  { %v26_v8 = vpop.permute.xlu0 %25 }
  0x82   :  { %v40_v9 = vshrl.u32 %v39_v7, 23  ;;  %v623_v10 = vmul.f32 %v490_v3, %v26_v8  ;;  %v43_v11 = vand.u32 8388607, %v36_v6  ;;  %vm37_vm15 = vcmp.le.f32.partialorder %v36_v6, 0.7853982 }
  0x84   :  { %v491_v12 = vadd.s32 4294967169, %v40_v9  ;;  %v142_v13 = vand.u32 2139095040, %v623_v10  ;;  %v44_v15 = vor.u32 8388608, %v43_v11  ;;  %v139_v17 = vand.u32 2147483647, %v623_v10 }
  0x86   :  { %v46_v14 = vadd.s32 1, %v491_v12  ;;  %v143_v16 = vshrl.u32 %v142_v13, 23  ;;  %v629_v22 = vshll.u32 %v44_v15, 8  ;;  %v146_v26 = vand.u32 8388607, %v139_v17 }
  0x88   :  { %vm47_vm0 = vcmp.gt.s32.totalorder %v46_v14, 0  ;;  %v495_v19 = vadd.s32 4294967169, %v143_v16  ;;  %v147_v56 = vor.u32 8388608, %v146_v26 }
  0x89   :  { %v48_v18 = vsel %vm47_vm0, %v46_v14, 0  ;;  %vm141_vm0 = vcmp.lt.s32.totalorder %v623_v10, 0 }
  0x8a   :  { %v49_v20 = vshrl.u32 %v48_v18, 5  ;;  %v50_v21 = vand.u32 31, %v48_v18  ;;  %v149_v27 = vadd.s32 1, %v495_v19  ;;  %v187_v7 = vshll.u32 %v147_v56, 8 }
  0x8c   :  { %v51_v23 = vsub.s32 32, %v50_v21  ;;  %v53_v25 = vshll.u32 %v580_v24, %v50_v21  ;;  %v56_v29 = vshll.u32 %v581_v28, %v50_v21  ;;  %v59_v31 = vshll.u32 %v582_v30, %v50_v21 }
  0x8d   :  { %v62_v33 = vshll.u32 %v583_v32, %v50_v21  ;;  %v65_v35 = vshll.u32 %v584_v34, %v50_v21  ;;  %vm68_vm1 = vcmp.lt.s32.totalorder %v49_v20, 1  ;;  %vm70_vm2 = vcmp.lt.s32.totalorder %v49_v20, 3 }
  0x8e   :  { %v54_v36 = vshrl.u32 %v581_v28, %v51_v23  ;;  %v57_v37 = vshrl.u32 %v582_v30, %v51_v23  ;;  %v60_v38 = vshrl.u32 %v583_v32, %v51_v23  ;;  %v52_v39 = vshrl.u32 %v580_v24, %v51_v23 }
  0x8f   :  { %v63_v40 = vshrl.u32 %v584_v34, %v51_v23  ;;  %v66_v42 = vshrl.u32 %v585_v41, %v51_v23  ;;  %vm150_vm3 = vcmp.gt.s32.totalorder %v149_v27, 0  ;;  %vm71_vm4 = vcmp.lt.s32.totalorder %v49_v20, 4 }
  0x90   :  { %v55_v43 = vor.u32 %v54_v36, %v53_v25  ;;  %v58_v44 = vor.u32 %v57_v37, %v56_v29  ;;  %v61_v45 = vor.u32 %v60_v38, %v59_v31  ;;  %v151_v48 = vsel %vm150_vm3, %v149_v27, 0 }
  0x91   :  { %v64_v46 = vor.u32 %v63_v40, %v62_v33  ;;  %v67_v47 = vor.u32 %v66_v42, %v65_v35  ;;  %vm69_vm5 = vcmp.lt.s32.totalorder %v49_v20, 2  ;;  %v153_v59 = vand.u32 31, %v151_v48 }
  0x92   :  { %v72_v49 = vsel %vm68_vm1, %v52_v39, %v55_v43  ;;  %v73_v50 = vsel %vm71_vm4, %v61_v45, 2102212464  ;;  %v76_v51 = vsel %vm68_vm1, %v55_v43, %v58_v44  ;;  %v80_v52 = vsel %vm68_vm1, %v58_v44, %v61_v45 }
  0x93   :  { %v74_v53 = vsel %vm70_vm2, %v58_v44, %v73_v50  ;;  %v77_v54 = vsel %vm71_vm4, %v64_v46, 920167782  ;;  %v81_v55 = vsel %vm71_vm4, %v67_v47, 1326507024  ;;  %v152_v3 = vshrl.u32 %v151_v48, 5 }
  0x94   :  { %v78_v57 = vsel %vm70_vm2, %v61_v45, %v77_v54  ;;  %v82_v58 = vsel %vm70_vm2, %v64_v46, %v81_v55  ;;  %v75_v60 = vsel %vm69_vm5, %v72_v49, %v74_v53  ;;  %v154_v4 = vsub.s32 32, %v153_v59 }
  0x95   :  { %v79_v61 = vsel %vm69_vm5, %v76_v51, %v78_v57  ;;  %v83_v62 = vsel %vm69_vm5, %v80_v52, %v82_v58  ;;  %v91_v8 = vmul.u32 %v629_v22, %v75_v60  ;;  %v156_v9 = vshll.u32 %v580_v24, %v153_v59 }
  0x96   :  { %v642_v63 = vmul.u32.u64.low %v629_v22, %v83_v62  ;;  %v643_v0 = vmul.u32.u64.high %v629_v22, %v83_v62, %v642_v63  ;;  %v646_v1 = vmul.u32.u64.low %v629_v22, %v79_v61  ;;  %v647_v2 = vmul.u32.u64.high %v629_v22, %v79_v61, %v646_v1 }
  0x97   :  { %v159_v11 = vshll.u32 %v581_v28, %v153_v59  ;;  %v162_v12 = vshll.u32 %v582_v30, %v153_v59  ;;  %v157_v13 = vshrl.u32 %v581_v28, %v154_v4  ;;  %v160_v14 = vshrl.u32 %v582_v30, %v154_v4 }
  0x98   :  { %v163_v15 = vshrl.u32 %v583_v32, %v154_v4  ;;  %v165_v16 = vshll.u32 %v583_v32, %v153_v59  ;;  %vm93_vm6 = vc.u32 %v643_v0, %v646_v1  ;;  %v94_v18 = vadd.s32 1, %v647_v2 }
  0x99   :  { %v166_v19 = vshrl.u32 %v584_v34, %v154_v4  ;;  %v168_v20 = vshll.u32 %v584_v34, %v153_v59  ;;  %v158_v21 = vor.u32 %v157_v13, %v156_v9  ;;  %v161_v23 = vor.u32 %v160_v14, %v159_v11 }
  0x9a   :  { %v164_v25 = vor.u32 %v163_v15, %v162_v12  ;;  %v169_v26 = vshrl.u32 %v585_v41, %v154_v4  ;;  %v95_v22 = vsel %vm93_vm6, %v94_v18, %v647_v2  ;;  %vm171_vm7 = vcmp.lt.s32.totalorder %v152_v3, 1 }
  0x9b   :  { %v167_v27 = vor.u32 %v166_v19, %v165_v16  ;;  %vm174_vm8 = vcmp.lt.s32.totalorder %v152_v3, 4  ;;  %v96_v28 = vadd.s32 %v95_v22, %v91_v8  ;;  %vm173_vm9 = vcmp.lt.s32.totalorder %v152_v3, 3 }
  0x9c   :  { %v170_v29 = vor.u32 %v169_v26, %v168_v20  ;;  %v176_v30 = vsel %vm174_vm8, %v164_v25, 2102212464  ;;  %v155_v31 = vshrl.u32 %v580_v24, %v154_v4  ;;  %v179_v32 = vsel %vm171_vm7, %v158_v21, %v161_v23 }
  0x9d   :  { %v180_v33 = vsel %vm174_vm8, %v167_v27, 920167782  ;;  %v183_v35 = vsel %vm171_vm7, %v161_v23, %v164_v25  ;;  %v97_v36 = vadd.s32 536870912, %v96_v28  ;;  %vm172_vm10 = vcmp.lt.s32.totalorder %v152_v3, 2 }
  0x9e   :  { %v181_v34 = vsel %vm173_vm9, %v164_v25, %v180_v33  ;;  %v184_v37 = vsel %vm174_vm8, %v170_v29, 1326507024  ;;  %v175_v38 = vsel %vm171_vm7, %v155_v31, %v158_v21  ;;  %v177_v39 = vsel %vm173_vm9, %v161_v23, %v176_v30 }
  0x9f   :  { %v182_v40 = vsel %vm172_vm10, %v179_v32, %v181_v34  ;;  %v185_v41 = vsel %vm173_vm9, %v167_v27, %v184_v37  ;;  %v98_v42 = vshrl.u32 %v97_v36, 30  ;;  %v178_v48 = vsel %vm172_vm10, %v175_v38, %v177_v39 }
  0xa0   :  { %v186_v43 = vsel %vm172_vm10, %v183_v35, %v185_v41  ;;  %v657_v44 = vmul.u32.u64.low %v187_v7, %v182_v40  ;;  %v658_v45 = vmul.u32.u64.high %v187_v7, %v182_v40, %v657_v44  ;;  %v194_v51 = vmul.u32 %v187_v7, %v178_v48 }
  0xa1   :  { %v660_v46 = vmul.u32.u64.low %v187_v7, %v186_v43  ;;  %v661_v47 = vmul.u32.u64.high %v187_v7, %v186_v43, %v660_v46  ;;  %v99_v24 = vshll.u32 %v98_v42, 30  ;;  %v92_v63 = vadd.s32 %v646_v1, %v643_v0 }
  0xa2   :  { %v197_v50 = vadd.s32 1, %v658_v45  ;;  %v122_v26 = vsub.s32 4, %v98_v42  ;;  %vm140_vm1 = vcmp.le.f32.partialorder %v139_v17, 0.7853982  ;;  %vm128_vm8 = vweird.f32 %v619_v5 }
  0xa3   :  { %v100_v49 = vsub.s32 %v96_v28, %v99_v24  ;;  %vm196_vm11 = vc.u32 %v661_v47, %v657_v44  ;;  %v195_v23 = vadd.s32 %v657_v44, %v661_v47 }
  0xa4   :  { %v198_v53 = vsel %vm196_vm11, %v197_v50, %v658_v45  ;;  %v123_v33 = vsel %vm38_vm14, %v122_v26, %v98_v42 }
  0xa5   :  { %v102_v52 = vsub.s32 0, %v100_v49  ;;  %v199_v54 = vadd.s32 %v198_v53, %v194_v51  ;;  %v125_v37 = vsel %vm37_vm15, 0, %v123_v33 }
  0xa6   :  { %v335_v39 = vadd.s32 3, %v125_v37  ;;  %v129_v44 = vand.u32 3, %v125_v37 }
  0xa7   :  { %v492_v55 = vmin.u32 %v102_v52, %v100_v49  ;;  %v200_v56 = vadd.s32 536870912, %v199_v54 }
  0xa8   :  { %v336_v45 = vand.u32 3, %v335_v39  ;;  %vm134_vm3 = vcmp.eq.s32.totalorder %v129_v44, 2  ;;  %vm131_vm5 = vcmp.eq.s32.totalorder %v129_v44, 0  ;;  %vm130_vm7 = vcmp.lt.s32.totalorder %v129_v44, 2 }
  0xa9   :  { %v104_v57 = vclz %v492_v55  ;;  %v201_v58 = vshrl.u32 %v200_v56, 30 }
  0xaa   :  { %vm341_vm2 = vcmp.eq.s32.totalorder %v336_v45, 2  ;;  %vm338_vm4 = vcmp.eq.s32.totalorder %v336_v45, 0  ;;  %vm337_vm6 = vcmp.lt.s32.totalorder %v336_v45, 2 }
  0xab   :  { %v493_v59 = vadd.s32 4294967294, %v104_v57  ;;  %v202_v60 = vshll.u32 %v201_v58, 30  ;;  %v225_v41 = vsub.s32 4, %v201_v58 }
  0xad   :  { %vm494_vm12 = vcmp.lt.s32.totalorder %v493_v59, 0  ;;  %v203_v62 = vsub.s32 %v199_v54, %v202_v60  ;;  %v226_v42 = vsel %vm141_vm0, %v225_v41, %v201_v58 }
  0xae   :  { %v107_v61 = vsel %vm494_vm12, 0, %v493_v59 }
  0xaf   :  { %v108_v2 = vsub.s32 32, %v107_v61  ;;  %v112_v3 = vsub.s32 4294967266, %v107_v61  ;;  %v205_v4 = vsub.s32 0, %v203_v62  ;;  %v109_v7 = vshll.u32 %v100_v49, %v107_v61 }
  0xb0   :  { %v228_v49 = vsel %vm140_vm1, 0, %v226_v42 }
  0xb1   :  { %v110_v8 = vshrl.u32 %v92_v63, %v108_v2  ;;  %v113_v9 = vadd.s32 127, %v112_v3  ;;  %v496_v11 = vmin.u32 %v205_v4, %v203_v62  ;;  %v439_v54 = vadd.s32 3, %v228_v49 }
  0xb2   :  { %v232_v58 = vand.u32 3, %v228_v49 }
  0xb3   :  { %v111_v12 = vor.u32 %v110_v8, %v109_v7  ;;  %v114_v13 = vshll.u32 %v113_v9, 23  ;;  %v207_v14 = vclz %v496_v11  ;;  %v440_v59 = vand.u32 3, %v439_v54 }
  0xb4   :  { %vm237_vm10 = vcmp.eq.s32.totalorder %v232_v58, 2  ;;  %vm234_vm12 = vcmp.eq.s32.totalorder %v232_v58, 0 }
  0xb5   :  { %v115_v15 = vor.u32 4788187, %v114_v13  ;;  %v497_v16 = vadd.s32 4294967294, %v207_v14  ;;  %v118_v19 = vcvt.s32.f32 %v111_v12  ;;  %vm445_vm9 = vcmp.eq.s32.totalorder %v440_v59, 2 }
  0xb6   :  { %vm442_vm11 = vcmp.eq.s32.totalorder %v440_v59, 0 }
  0xb7   :  { %v116_v18 = vand.u32 2147483647, %v115_v15  ;;  %vm498_vm13 = vcmp.lt.s32.totalorder %v497_v16, 0 }
  0xb8   :  { %v210_v21 = vsel %vm498_vm13, 0, %v497_v16  ;;  %vm441_vm13 = vcmp.lt.s32.totalorder %v440_v59, 2 }
  0xb9   :  { %v119_v20 = vmul.f32 %v118_v19, %v116_v18  ;;  %v211_v0 = vsub.s32 32, %v210_v21  ;;  %v215_v1 = vsub.s32 4294967266, %v210_v21  ;;  %v212_v22 = vshll.u32 %v203_v62, %v210_v21 }
  0xbb   :  { %v120_v25 = vxor.u32 2147483648, %v119_v20  ;;  %v213_v27 = vshrl.u32 %v195_v23, %v211_v0  ;;  %v216_v28 = vadd.s32 127, %v215_v1 }
  0xbd   :  { %v121_v29 = vsel %vm38_vm14, %v120_v25, %v119_v20  ;;  %v214_v31 = vor.u32 %v213_v27, %v212_v22  ;;  %v217_v32 = vshll.u32 %v216_v28, 23  ;;  %vm233_vm14 = vcmp.lt.s32.totalorder %v232_v58, 2 }
  0xbe   :  { %v124_v30 = vsel %vm37_vm15, %v619_v5, %v121_v29  ;;  %vm231_vm15 = vweird.f32 %v623_v10 }
  0xbf   :  { %527 = vcosq.f32 %v124_v30  ;;  %v218_v35 = vor.u32 4788187, %v217_v32  ;;  %v221_v34 = vcvt.s32.f32 %v214_v31 }
  0xc0   :  { %529 = vsinq.f32 %v124_v30 }
  0xc1   :  { %v219_v36 = vand.u32 2147483647, %v218_v35 }
  0xc3   :  { %v222_v38 = vmul.f32 %v221_v34, %v219_v36 }
  0xc5   :  { %v223_v40 = vxor.u32 2147483648, %v222_v38 }
  0xc7   :  { %v224_v6 = vsel %vm141_vm0, %v223_v40, %v222_v38 }
  0xc8   :  { %v227_v43 = vsel %vm140_vm1, %v623_v10, %v224_v6 }
  0xc9   :  { %531 = vcosq.f32 %v227_v43 }
  0xca   :  { %533 = vsinq.f32 %v227_v43 }
  0xcc   :  { %v528_v46 = vpop.eup %527 }
  0xcd   :  { %v530_v47 = vpop.eup %529  ;;  %v135_v24 = vxor.u32 2147483648, %v528_v46 }
  0xce   :  { %v132_v48 = vxor.u32 2147483648, %v530_v47 }
  0xcf   :  { %v343_v50 = vsel %vm341_vm2, %v135_v24, %v530_v47  ;;  %v136_v51 = vsel %vm134_vm3, %v135_v24, %v530_v47 }
  0xd0   :  { %v340_v17 = vsel %vm338_vm4, %v528_v46, %v132_v48  ;;  %v133_v52 = vsel %vm131_vm5, %v528_v46, %v132_v48 }
  0xd1   :  { %v344_v53 = vsel %vm337_vm6, %v340_v17, %v343_v50  ;;  %v137_v55 = vsel %vm130_vm7, %v133_v52, %v136_v51 }
  0xd2   :  { %v345_v56 = vsel %vm128_vm8, nan, %v344_v53  ;;  %v138_v57 = vsel %vm128_vm8, nan, %v137_v55 }
  0xd3   :  { %454 = vst [vmem:[#allocation4] sm:$0xff] %v345_v56  ;;  %456 = vst [vmem:[#allocation4 + $0x8] sm:$0xff] %v345_v56 }
  0xd4   :  { %450 = vst [vmem:[#allocation2] sm:$0xff] %v138_v57  ;;  %452 = vst [vmem:[#allocation2 + $0x8] sm:$0xff] %v138_v57 }
  0xd6   :  { %v532_v60 = vpop.eup %531 }
  0xd7   :  { %v534_v61 = vpop.eup %533  ;;  %v238_v62 = vxor.u32 2147483648, %v532_v60 }
  0xd8   :  { %v235_v63 = vxor.u32 2147483648, %v534_v61 }
  0xd9   :  { %v447_v5 = vsel %vm445_vm9, %v238_v62, %v534_v61  ;;  %v239_v2 = vsel %vm237_vm10, %v238_v62, %v534_v61 }
  0xda   :  { %v444_v3 = vsel %vm442_vm11, %v532_v60, %v235_v63  ;;  %v236_v4 = vsel %vm234_vm12, %v532_v60, %v235_v63 }
  0xdb   :  { %v448_v7 = vsel %vm441_vm13, %v444_v3, %v447_v5  ;;  %v240_v8 = vsel %vm233_vm14, %v236_v4, %v239_v2 }
  0xdc   :  { %v449_v9 = vsel %vm231_vm15, nan, %v448_v7  ;;  %v241_v11 = vsel %vm231_vm15, nan, %v240_v8 }
  0xdd   :  { %455 = vst [vmem:[#allocation4 + $0x10] sm:$0xff] %v449_v9  ;;  %457 = vst [vmem:[#allocation4 + $0x18] sm:$0xff] %v449_v9 }
  0xde   :  { %451 = vst [vmem:[#allocation2 + $0x10] sm:$0xff] %v241_v11  ;;  %453 = vst [vmem:[#allocation2 + $0x18] sm:$0xff] %v241_v11 }
  0xdf   :  { %546 = shalt.err (!%p543_p4)
}
  0xe0   :  { %s588_s21 = smov 256   ;;  %s589_s22 = smov 16  }
  0xe1   :  { %469 = dma.vmem_to_hbm [thread:$0]  %s464_s1, 512, %s687_s2, [#allocation3], %s588_s21, %s588_s21, %s589_s22  }
  0xe2   :  { %s555_s25 = scalar_lea.vmem %s476_s19, 512  ;;  %p560_p6 = scmp.lt.s32.totalorder %s476_s19, %s476_s19 }
  0xe3   :  { %p556_p5 = scmp.ne.s32.totalorder %s476_s19, %s555_s25  ;;  %p561_p7 = scmp.lt.s32.totalorder %s555_s25, %s555_s25 }
  0xe5   :  { %p562_p8 = por %p561_p7, %p560_p6 }
  0xe7   :  { %p563_p9 = pnand %p562_p8, %p556_p5 }
  0xe9   :  { %566 = shalt.err (!%p563_p9)
}
  0xea   :  { %481 = dma.vmem_to_hbm [thread:$0]  %s476_s19, 512, %s688_s3, [#allocation5], %s588_s21, %s588_s21, %s589_s22  }
  0xeb   :  { %575 = dma.done.wait [#allocation3], 512  }
  0xec   :  { %576 = vsyncadd [#allocation3], 4294966784 }
  0xed   :  { %577 = dma.done.wait [#allocation5], 512  }
  0xee   :  { %578 = vsyncadd [#allocation5], 4294966784 }
  0xef   :  { %488 = vsyncpa [#allocation3], 1 }
  0xf0   :  { %489 = vsyncpa [#allocation5], 1 }

</bundles_post_ra>
